<compile_context>
chip_gen: v7x
topology: tpu7x:2x2x1
jax: 0.10.0
libtpu: 0.0.40
codegen_flags: <defaults>
</compile_context>

<pallas_src>
import math

import jax
import jax.numpy as jnp
import numpy as np
from jax.experimental import pallas as pl
from jax.experimental.pallas import tpu as pltpu


# ---------------------------------------------------------------------------
# Kernels
# ---------------------------------------------------------------------------
def _gcn_kernel_resident(adj_ref, x_ref, w_ref, b_ref, o_ref):
    # x fully VMEM-resident -> whole contraction in one dot per row tile.
    agg = jnp.dot(adj_ref[...], x_ref[...], preferred_element_type=jnp.float32)
    o_ref[...] = (jnp.dot(agg, w_ref[...], preferred_element_type=jnp.float32)
                  + b_ref[...]).astype(o_ref.dtype)


def _gcn_kernel_stream_agg_first(adj_ref, x_ref, w_ref, b_ref, o_ref, acc_ref):
    # acc[tm, in_dim] += adj_tile @ x_tile ; project + bias in the epilogue.
    k = pl.program_id(1)

    @pl.when(k == 0)
    def _():
        acc_ref[...] = jnp.zeros_like(acc_ref)

    acc_ref[...] += jnp.dot(adj_ref[...], x_ref[...],
                            preferred_element_type=jnp.float32)

    @pl.when(k == pl.num_programs(1) - 1)
    def _():
        o_ref[...] = (jnp.dot(acc_ref[...], w_ref[...],
                              preferred_element_type=jnp.float32)
                      + b_ref[...]).astype(o_ref.dtype)


def _gcn_kernel_stream_proj_first(adj_ref, x_ref, w_ref, b_ref, o_ref, acc_ref):
    # y = x_tile @ w ; acc[tm, out_dim] += adj_tile @ y ; bias in the epilogue.
    k = pl.program_id(1)

    @pl.when(k == 0)
    def _():
        acc_ref[...] = jnp.zeros_like(acc_ref)

    y = jnp.dot(x_ref[...], w_ref[...], preferred_element_type=jnp.float32)
    acc_ref[...] += jnp.dot(adj_ref[...], y.astype(adj_ref.dtype),
                            preferred_element_type=jnp.float32)

    @pl.when(k == pl.num_programs(1) - 1)
    def _():
        o_ref[...] = (acc_ref[...] + b_ref[...]).astype(o_ref.dtype)


# ---------------------------------------------------------------------------
# Helpers
# ---------------------------------------------------------------------------
def _round_up(v, m):
    return ((v + m - 1) // m) * m


def _largest_tile(total, requested, granularity=128):
    """Largest multiple of `granularity` dividing `total`, <= requested."""
    t = max(granularity, min(requested, total))
    t = (t // granularity) * granularity
    while total % t != 0:
        t -= granularity
    return t


# ---------------------------------------------------------------------------
# Wrapper
# ---------------------------------------------------------------------------
def gcn_conv(x, adj, w, b, *, tm=512, tk=512,
             compute_dtype=jnp.bfloat16,
             x_resident_max_bytes=8 * 1024 * 1024):
    n, in_dim = x.shape
    out_dim = w.shape[1]
    out_dtype = x.dtype

    # ---- pad node count to a multiple of 128 (zero rows/cols are harmless) --
    n_pad = _round_up(n, 128)
    if n_pad != n:
        x = jnp.pad(x, ((0, n_pad - n), (0, 0)))
        adj = jnp.pad(adj, ((0, n_pad - n), (0, n_pad - n)))

    # Streamed operands in compute_dtype (bf16 halves adj HBM traffic);
    # params and all MXU accumulation stay f32.
    cd = jnp.dtype(compute_dtype)
    adj = adj.astype(cd)
    x = x.astype(cd)
    w = w.astype(jnp.float32)
    b2 = b.reshape(1, out_dim).astype(jnp.float32)

    # ---- tile selection ------------------------------------------------------
    tm = _largest_tile(n_pad, tm)
    tk = _largest_tile(n_pad, tk)
    # v7x has 2 TensorCores: keep >= 2 tiles on the parallel (row) axis.
    if n_pad // tm < 2 and n_pad >= 256:
        tm = _largest_tile(n_pad, n_pad // 2)

    itemsize_out = jnp.dtype(out_dtype).itemsize
    bytes_adj = n_pad * n_pad * cd.itemsize
    bytes_params = in_dim * out_dim * 4 + out_dim * 4
    bytes_out = n_pad * out_dim * itemsize_out

    x_resident = (n_pad * in_dim * cd.itemsize) <= x_resident_max_bytes

    if x_resident:
        grid = (n_pad // tm,)
        in_specs = [
            pl.BlockSpec((tm, n_pad), lambda i: (i, 0)),         # adj row tile
            pl.BlockSpec((n_pad, in_dim), lambda i: (0, 0)),     # x (resident)
            pl.BlockSpec((in_dim, out_dim), lambda i: (0, 0)),   # w (resident)
            pl.BlockSpec((1, out_dim), lambda i: (0, 0)),        # bias (resident)
        ]
        out_specs = pl.BlockSpec((tm, out_dim), lambda i: (i, 0))
        scratch_shapes = []
        kernel = _gcn_kernel_resident
        dims = ("parallel",)
        flops = 2 * n_pad * n_pad * in_dim + 2 * n_pad * in_dim * out_dim
        bytes_accessed = (bytes_adj + n_pad * in_dim * cd.itemsize
                          + bytes_params + bytes_out)
        vmem_est = (2 * tm * n_pad * cd.itemsize            # adj (double buffer)
                    + n_pad * in_dim * cd.itemsize           # resident x
                    + 2 * tm * out_dim * itemsize_out        # out (double buffer)
                    + bytes_params)
    else:
        # Streamed path: shape-dependent fusion order (smaller total FLOPs
        # also means smaller accumulator + less RMW traffic).
        flops_agg = 2 * n_pad * n_pad * in_dim + 2 * n_pad * in_dim * out_dim
        flops_proj = (2 * (n_pad // tm) * n_pad * in_dim * out_dim
                      + 2 * n_pad * n_pad * out_dim)
        project_first = flops_proj < flops_agg
        acc_dim = out_dim if project_first else in_dim
        kernel = (_gcn_kernel_stream_proj_first if project_first
                  else _gcn_kernel_stream_agg_first)
        grid = (n_pad // tm, n_pad // tk)
        in_specs = [
            pl.BlockSpec((tm, tk), lambda i, k: (i, k)),          # adj tile
            pl.BlockSpec((tk, in_dim), lambda i, k: (k, 0)),      # x tile
            pl.BlockSpec((in_dim, out_dim), lambda i, k: (0, 0)),  # w (resident)
            pl.BlockSpec((1, out_dim), lambda i, k: (0, 0)),       # bias
        ]
        out_specs = pl.BlockSpec((tm, out_dim), lambda i, k: (i, 0))
        scratch_shapes = [pltpu.VMEM((tm, acc_dim), jnp.float32)]
        dims = ("parallel", "arbitrary")
        flops = flops_proj if project_first else flops_agg
        bytes_accessed = (bytes_adj
                          + (n_pad // tm) * n_pad * in_dim * cd.itemsize
                          + bytes_params + bytes_out)
        vmem_est = (2 * tm * tk * cd.itemsize
                    + 2 * tk * in_dim * cd.itemsize
                    + 2 * tm * out_dim * itemsize_out
                    + tm * acc_dim * 4
                    + bytes_params)

    # Enough VMEM for double-buffered tiles + headroom; never request the whole
    # physical VMEM (v7x only has 64 MiB per TensorCore).
    vmem_limit = int(min(max(2 * vmem_est, 32 * 1024 * 1024), 48 * 1024 * 1024))

    out = pl.pallas_call(
        kernel,
        out_shape=jax.ShapeDtypeStruct((n_pad, out_dim), out_dtype),
        grid_spec=pltpu.PrefetchScalarGridSpec(
            num_scalar_prefetch=0,
            grid=grid,
            in_specs=in_specs,
            out_specs=out_specs,
            scratch_shapes=scratch_shapes,
        ),
        compiler_params=pltpu.CompilerParams(
            dimension_semantics=dims,
            vmem_limit_bytes=vmem_limit,
        ),
        cost_estimate=pl.CostEstimate(flops=int(flops), transcendentals=0,
                                      bytes_accessed=int(bytes_accessed)),
    )(adj, x, w, b2)

    return out[:n]


# ---------------------------------------------------------------------------
# Pure-JAX reference (mirrors the PyTorch forward, eval mode / no dropout)
# ---------------------------------------------------------------------------
def gcn_conv_ref(x, adj, w, b):
    return adj @ (x @ w) + b


# ---------------------------------------------------------------------------
# Self-test
# ---------------------------------------------------------------------------
if __name__ == "__main__":
    def make_inputs(key, n, in_dim, out_dim):
        k1, k2, k3, k4 = jax.random.split(key, 4)
        x = jax.random.normal(k1, (n, in_dim), jnp.float32)
        # Dense stand-in for the sparse normalized adjacency: random sparse
        # connectivity + self loops, row-normalized.
        a = (jax.random.uniform(k2, (n, n)) < 0.05).astype(jnp.float32)
        a = a + jnp.eye(n, dtype=jnp.float32)
        adj = a / a.sum(axis=1, keepdims=True)
        limit = math.sqrt(6.0 / (in_dim + out_dim))
        w = jax.random.uniform(k3, (in_dim, out_dim), jnp.float32, -limit, limit)
        b = jax.random.normal(k4, (out_dim,), jnp.float32) * 0.1
        return x, adj, w, b

    # Main example: N graph nodes, in_dim -> out_dim.
    x, adj, w, b = make_inputs(jax.random.PRNGKey(0), 256, 128, 128)
    ref = gcn_conv_ref(x, adj, w, b)

    # 1) Resident-x fast path, f32 compute: tight check.
    out_f32 = jax.block_until_ready(gcn_conv(x, adj, w, b,
                                             compute_dtype=jnp.float32))
    np.testing.assert_allclose(np.asarray(out_f32), np.asarray(ref),
                               rtol=1e-4, atol=1e-4)

    # 2) Default bf16 streamed operands + f32 accumulation: loose check.
    out_bf16 = jax.block_until_ready(gcn_conv(x, adj, w, b))
    np.testing.assert_allclose(np.asarray(out_bf16), np.asarray(ref),
                               rtol=2e-2, atol=2e-2)

    # 3) Forced streamed path (k reduction axis, aggregate-first), f32: tight.
    out_stream = jax.block_until_ready(
        gcn_conv(x, adj, w, b, tm=128, tk=128, compute_dtype=jnp.float32,
                 x_resident_max_bytes=0))
    np.testing.assert_allclose(np.asarray(out_stream), np.asarray(ref),
                               rtol=1e-4, atol=1e-4)

    # 4) Asymmetric dims -> project-first streamed kernel, f32: tight.
    xa, adja, wa, ba = make_inputs(jax.random.PRNGKey(1), 256, 128, 32)
    refa = gcn_conv_ref(xa, adja, wa, ba)
    outa = jax.block_until_ready(
        gcn_conv(xa, adja, wa, ba, tm=128, tk=128, compute_dtype=jnp.float32,
                 x_resident_max_bytes=0))
    np.testing.assert_allclose(np.asarray(outa), np.asarray(refa),
                               rtol=1e-4, atol=1e-4)

    # 5) Non-128-multiple node count exercises the zero-padding path.
    x2, adj2, w2, b2 = make_inputs(jax.random.PRNGKey(2), 200, 128, 128)
    ref2 = gcn_conv_ref(x2, adj2, w2, b2)
    out2 = jax.block_until_ready(gcn_conv(x2, adj2, w2, b2,
                                          compute_dtype=jnp.float32))
    np.testing.assert_allclose(np.asarray(out2), np.asarray(ref2),
                               rtol=1e-4, atol=1e-4)

    print("KERNEL_OK")
</pallas_src>

<mosaic_0001>
module attributes {stable_mosaic.version = 11 : i64} {
  func.func @_gcn_kernel_resident(%arg0: i32, %arg1: memref<128x256xf32, #tpu.memory_space<vmem>>, %arg2: memref<256x128xf32, #tpu.memory_space<vmem>>, %arg3: memref<128x128xf32, #tpu.memory_space<vmem>>, %arg4: memref<1x128xf32, #tpu.memory_space<vmem>>, %arg5: memref<128x128xf32, #tpu.memory_space<vmem>>) attributes {dimension_semantics = [#tpu.dimension_semantics<parallel>], iteration_bounds = array<i64: 2>, scalar_prefetch = 0 : i64, scratch_operands = 0 : i64, tpu.core_type = #tpu.core_type<tc>, window_params = [{transform_indices = @transform_0, window_bounds = array<i64: 128, 256>}, {pipeline_mode = #tpu.pipeline_mode<synchronous>, transform_indices = @transform_1, window_bounds = array<i64: 256, 128>}, {pipeline_mode = #tpu.pipeline_mode<synchronous>, transform_indices = @transform_2, window_bounds = array<i64: 128, 128>}, {pipeline_mode = #tpu.pipeline_mode<synchronous>, transform_indices = @transform_3, window_bounds = array<i64: 1, 128>}, {transform_indices = @transform_4, window_bounds = array<i64: 128, 128>}]} {
    %c0 = arith.constant 0 : index
    %c0_0 = arith.constant 0 : index
    %0 = vector.load %arg1[%c0, %c0_0] : memref<128x256xf32, #tpu.memory_space<vmem>>, vector<128x256xf32>
    %c0_1 = arith.constant 0 : index
    %c0_2 = arith.constant 0 : index
    %1 = vector.load %arg2[%c0_1, %c0_2] : memref<256x128xf32, #tpu.memory_space<vmem>>, vector<256x128xf32>
    %cst = arith.constant dense<0.000000e+00> : vector<128x128xf32>
    %2 = tpu.matmul %0, %1, %cst {dimension_numbers = #tpu.dot_dimension_numbers<[1], [0], [0], [1], [0, 0, 1, 1], [], []>} : vector<128x256xf32>, vector<256x128xf32>, vector<128x128xf32> -> vector<128x128xf32>
    %c0_3 = arith.constant 0 : index
    %c0_4 = arith.constant 0 : index
    %3 = vector.load %arg3[%c0_3, %c0_4] : memref<128x128xf32, #tpu.memory_space<vmem>>, vector<128x128xf32>
    %cst_5 = arith.constant dense<0.000000e+00> : vector<128x128xf32>
    %4 = tpu.matmul %2, %3, %cst_5 {dimension_numbers = #tpu.dot_dimension_numbers<[1], [0], [0], [1], [0, 0, 1, 1], [], []>} : vector<128x128xf32>, vector<128x128xf32>, vector<128x128xf32> -> vector<128x128xf32>
    %c0_6 = arith.constant 0 : index
    %c0_7 = arith.constant 0 : index
    %5 = vector.load %arg4[%c0_6, %c0_7] : memref<1x128xf32, #tpu.memory_space<vmem>>, vector<1x128xf32>
    %6 = vector.broadcast %5 : vector<1x128xf32> to vector<128x128xf32>
    %7 = arith.addf %4, %6 : vector<128x128xf32>
    %c0_8 = arith.constant 0 : index
    %c0_9 = arith.constant 0 : index
    %8 = vector.load %arg5[%c0_8, %c0_9] : memref<128x128xf32, #tpu.memory_space<vmem>>, vector<128x128xf32>
    tpu.vector_store %arg5[%c0_8, %c0_9], %7 {strides = array<i32>} : memref<128x128xf32, #tpu.memory_space<vmem>>, vector<128x128xf32>,
    return
  }
  func.func @transform_0(%arg0: i32) -> (i32, i32) {
    %c0_i32 = arith.constant 0 : i32
    %c0_i32_0 = arith.constant 0 : i32
    return %arg0, %c0_i32 : i32, i32
  }
  func.func @transform_1(%arg0: i32) -> (i32, i32) {
    %c0_i32 = arith.constant 0 : i32
    %c0_i32_0 = arith.constant 0 : i32
    %c0_i32_1 = arith.constant 0 : i32
    return %c0_i32, %c0_i32_0 : i32, i32
  }
  func.func @transform_2(%arg0: i32) -> (i32, i32) {
    %c0_i32 = arith.constant 0 : i32
    %c0_i32_0 = arith.constant 0 : i32
    %c0_i32_1 = arith.constant 0 : i32
    return %c0_i32, %c0_i32_0 : i32, i32
  }
  func.func @transform_3(%arg0: i32) -> (i32, i32) {
    %c0_i32 = arith.constant 0 : i32
    %c0_i32_0 = arith.constant 0 : i32
    %c0_i32_1 = arith.constant 0 : i32
    return %c0_i32, %c0_i32_0 : i32, i32
  }
  func.func @transform_4(%arg0: i32) -> (i32, i32) {
    %c0_i32 = arith.constant 0 : i32
    %c0_i32_0 = arith.constant 0 : i32
    return %arg0, %c0_i32 : i32, i32
  }
}

</mosaic_0001>

<bundles_post_ra>
// kernel: tpu_custom_call.1
= control target key start
LH: loop header
LB: loop body
LE: loop exit
PB: predicated region body
PF: predicated region fallthrough
CT: control target
= control target key end

     0   :  { %9 = vsyncpa [#allocation3], 0  ;;  %s1559_s0 = inlined_call_operand.hbm [shape: f32[256,256], index: 0, kind: input, shape index: {}]   ;;  %s1560_s1 = inlined_call_operand.hbm [shape: f32[256,128], index: 1, kind: input, shape index: {}]   ;;  %s1561_s2 = inlined_call_operand.hbm [shape: f32[128,128], index: 2, kind: input, shape index: {}]   ;;  %s1562_s3 = inlined_call_operand.vmem [shape: f32[1,128], index: 3, kind: input, shape index: {}]   ;;  %s1563_s4 = inlined_call_operand.hbm [shape: f32[256,128], index: 4, kind: output, shape index: {}]  }
   0x1   :  { %11 = vsyncpa [#allocation3 + $0x1], 0 }
   0x2   :  { %12 = vsyncpa [#allocation6], 0 }
   0x3   :  { %13 = vsyncpa [#allocation4], 0 }
   0x4   :  { %15 = vsyncpa [#allocation4 + $0x1], 0  ;;  %s1268_s15 = smov 0   ;;  %s1270_s16 = smov 0  }
   0x5   :  { %s1272_s17 = smov 0   ;;  %s1274_s18 = smov 0  }
   0x6 LB: > { %s1289_s19 = sadd.s32 4294967295, %s1231_s18   ;;  %s747_s20 = sadd.s32 4294967294, %s1231_s18   ;;  %s1231_s18 = sphi %s1274_s18, %s1583_s18   ;;  %s1227_s17 = sphi %s1272_s17, %s1582_s17   ;;  %s1223_s16 = sphi %s1270_s16, %s1581_s16   ;;  %s1219_s15 = sphi %s1268_s15, %s1580_s15  }
   0x7   : > { %p41_p0 = scmp.ne.s32.totalorder %s1223_s16, %s1219_s15  ;;  %p1564_p1 = scmp.eq.s32.totalorder %s1289_s19, 0 }
   0x8   : > { %p134_p3 = scmp.eq.s32.totalorder %s747_s20, 1  ;;  %p748_p5 = scmp.ge.s32.totalorder %s1231_s18, 1 }
   0x9   : > { %p1298_p4 = por %p1564_p1, %p41_p0  ;;  %p141_p7 = scmp.lt.s32.totalorder %s1231_s18, 3 }
   0xa   : > { %p1303_p6 = por %p134_p3, %p41_p0  ;;  %s1233_s24 = smov [#allocation5]  }
   0xb   : > { %s1567_s21 = scalar_select %p1298_p4, 1, 0 }
   0xc   : > { %s1568_s22 = scalar_select %p1303_p6, 1, 0 }
   0xd   : > { %p1308_p8 = pnand %p748_p5, %p141_p7  ;;  %s153_s25 = sshll.u32 %s1233_s24, 4  ;;  %s1312_s25 = int_to_ptr.vmem [resolvable:$true] %s153_s25 }
   0xe   : > { %s1234_s27 = smov [#allocation7]   ;;  %s1075_s5 = scalar_lea.hbm %s1560_s1, 4096 }
   0xf   : > { %p1014_p9 = pneg %p1308_p8  ;;  %s166_s28 = sshll.u32 %s1234_s27, 4  ;;  %s1323_s28 = int_to_ptr.vmem [resolvable:$true] %s166_s28 }
  0x10   : > { %p1076_p12 = scmp.ne.s32.totalorder %s1560_s1, %s1075_s5  ;;  %p1082_p5 = scmp.lt.u32.totalorder %s1075_s5, %s1560_s1 }
  0x11   : > { %p1319_p11 = pnand %p1014_p9, %p1564_p1 }
  0x13   : > { %p1077_p13 = pneg %p1319_p11 }
  0x15   : > { %p1078_p0 = pnand %p1077_p13, %p1076_p12 }
  0x17   : > { %p1079_p3 = pneg %p1078_p0 }
  0x19   : > { %p1084_p7 = pnand %p1082_p5, %p1079_p3 }
  0x1b   : > { %1087 = shalt.err (!%p1084_p7)
}
  0x1c   : > { %s1088_s10 = scalar_lea.vmem %s1312_s25, 4096  ;;  %p1096_p2 = scmp.lt.s32.totalorder %s1312_s25, %s1312_s25 }
  0x1d   : > { %p1089_p9 = scmp.ne.s32.totalorder %s1312_s25, %s1088_s10  ;;  %p1097_p12 = scmp.lt.s32.totalorder %s1088_s10, %s1088_s10 }
  0x1f   : > { %p1091_p10 = pnand %p1089_p9, %p1077_p13  ;;  %p1098_p0 = por %p1097_p12, %p1096_p2 }
  0x21   : > { %p1092_p1 = pneg %p1091_p10 }
  0x23   : > { %p1099_p6 = pnand %p1098_p0, %p1092_p1 }
  0x25   : > { %1102 = shalt.err (!%p1099_p6)
}
  0x26   : > { %s1235_s11 = smov 128   ;;  %s1236_s12 = smov 8  }
  0x27   : > { %1017 = dma.hbm_to_vmem [thread:$0]  (!%p1319_p11), %s1560_s1, 4096, %s1312_s25, [#allocation6], %s1235_s11, %s1235_s11, %s1236_s12  }
  0x28   : > { %s1103_s27 = scalar_lea.hbm %s1561_s2, 2048 }
  0x29   : > { %p1104_p2 = scmp.ne.s32.totalorder %s1561_s2, %s1103_s27  ;;  %p1110_p10 = scmp.lt.u32.totalorder %s1103_s27, %s1561_s2 }
  0x2b   : > { %p1106_p1 = pnand %p1104_p2, %p1077_p13 }
  0x2d   : > { %p1107_p6 = pneg %p1106_p1 }
  0x2f   : > { %p1112_p3 = pnand %p1110_p10, %p1107_p6 }
  0x31   : > { %1115 = shalt.err (!%p1112_p3)
}
  0x32   : > { %s1116_s25 = scalar_lea.vmem %s1323_s28, 2048  ;;  %p1124_p12 = scmp.lt.s32.totalorder %s1323_s28, %s1323_s28 }
  0x33   : > { %p1117_p5 = scmp.ne.s32.totalorder %s1323_s28, %s1116_s25  ;;  %p1125_p0 = scmp.lt.s32.totalorder %s1116_s25, %s1116_s25 }
  0x35   : > { %p1119_p7 = pnand %p1117_p5, %p1077_p13  ;;  %p1126_p2 = por %p1125_p0, %p1124_p12 }
  0x37   : > { %p1120_p9 = pneg %p1119_p7 }
  0x39   : > { %p1127_p1 = pnand %p1126_p2, %p1120_p9 }
  0x3b   : > { %1130 = shalt.err (!%p1127_p1)
}
  0x3c   : > { %1020 = dma.hbm_to_vmem [thread:$0]  (!%p1319_p11), %s1561_s2, 2048, %s1323_s28, [#allocation6], %s1235_s11, %s1235_s11, %s1236_s12  }
  0x3d   : > { %s1378_s9 = sadd.s32 1, %s1231_s18   ;;  %s28_s26 = sadd.s32 1, %s1227_s17 }
  0x3e   : > { %s25_s10 = ssub.s32 %s1231_s18, %s1378_s9  ;;  %p35_p13 = scmp.ne.s32.totalorder %s1227_s17, %s1223_s16 }
  0x3f   : > { %p26_p6 = scmp.eq.s32.totalorder %s25_s10, 0  ;;  %p36_p10 = scmp.eq.s32.totalorder %s1231_s18, 0 }
  0x40   : > { %p1571_p3 = scmp.eq.s32.totalorder %s1289_s19, 1  ;;  %p1031_p7 = scmp.lt.s32.totalorder %s1231_s18, 2 }
  0x41   : > { %s1394_s14 = scalar_select %p26_p6, %s1227_s17, %s28_s26  }
  0x42   : > { %p1388_p5 = por %p1571_p3, %p35_p13  ;;  %p37_p9 = por %p36_p10, %p35_p13 }
  0x43   : > { %s183_s20 = sand.u32 1, %s1227_s17   ;;  %s768_s28 = sshll.u32 %s1231_s18, 12 }
  0x44   : > { %s1572_s13 = scalar_select %p1388_p5, 1, 0 }
  0x45   : > { %s752_s24 = sshll.u32 %s183_s20, 8  ;;  %s1401_s27 = scalar_lea.hbm %s1559_s0, %s768_s28 }
  0x46   : > { %s187_s29 = scalar_lea.vmem [#allocation2], %s752_s24  ;;  %p1405_p11 = pnand %p1031_p7, %p37_p9 }
  0x47   : > { %s195_s30 = sshll.u32 %s187_s29, 4  ;;  %s1409_s6 = scalar_lea.sflag [#allocation3], %s183_s20  ;;  %s1403_s30 = int_to_ptr.vmem [resolvable:$true] %s195_s30 }
  0x48   : > { %s1131_s25 = scalar_lea.hbm %s1401_s27, 4096  ;;  %p1133_p0 = pneg %p1405_p11 }
  0x49   : > { %p1132_p12 = scmp.ne.s32.totalorder %s1401_s27, %s1131_s25  ;;  %s1136_s26 = scalar_lea.hbm %s1559_s0, 8192 }
  0x4a   : > { %p1137_p13 = scmp.lt.u32.totalorder %s1401_s27, %s1559_s0  ;;  %p1138_p6 = scmp.lt.u32.totalorder %s1136_s26, %s1131_s25 }
  0x4b   : > { %p1134_p2 = pnand %p1133_p0, %p1132_p12  ;;  %p1140_p3 = scmp.lt.u32.totalorder %s1131_s25, %s1401_s27 }
  0x4c   : > { %p1139_p10 = por %p1138_p6, %p1137_p13 }
  0x4d   : > { %p1135_p1 = pneg %p1134_p2 }
  0x4e   : > { %p1141_p7 = por %p1140_p3, %p1139_p10 }
  0x50   : > { %p1142_p9 = pnand %p1141_p7, %p1135_p1 }
  0x52   : > { %1145 = shalt.err (!%p1142_p9)
}
  0x53   : > { %s1146_s20 = scalar_lea.vmem %s1403_s30, 4096  ;;  %s1237_s28 = smov [#allocation2]  }
  0x54   : > { %p1147_p12 = scmp.ne.s32.totalorder %s1403_s30, %s1146_s20  ;;  %s1151_s11 = sshll.u32 %s1237_s28, 4  ;;  %s1152_s11 = int_to_ptr.vmem [resolvable:$false] %s1151_s11 }
  0x55   : > { %s1153_s12 = scalar_lea.vmem %s1152_s11, 8192  ;;  %p1154_p4 = scmp.lt.s32.totalorder %s1403_s30, %s1152_s11 }
  0x56   : > { %p1149_p2 = pnand %p1147_p12, %p1133_p0  ;;  %p1155_p13 = scmp.lt.s32.totalorder %s1153_s12, %s1146_s20 }
  0x58   : > { %p1150_p5 = pneg %p1149_p2  ;;  %p1156_p6 = por %p1155_p13, %p1154_p4 }
  0x5a   : > { %p1157_p10 = pnand %p1156_p6, %p1150_p5 }
  0x5c   : > { %1160 = shalt.err (!%p1157_p10)
}
  0x5d   : > { %s1238_s29 = smov 256   ;;  %s1239_s25 = smov 16  }
  0x5e   : > { %1024 = dma.hbm_to_vmem [thread:$0]  (!%p1405_p11), %s1401_s27, 4096, %s1403_s30, %s1409_s6, %s1238_s29, %s1238_s29, %s1239_s25  }
  0x5f   : > { %207 = sbr.rel (%p1308_p8) target bundleno = 646 (0x286), region = 36  ;;  %s1440_s7 = sand.u32 (!%p1308_p8), 1, %s1223_s16  }
  0x60   : > { %s757_s8 = sshll.u32 (!%p1308_p8), %s1440_s7, 8  ;;  %s210_s26 = scalar_lea.sflag (!%p1308_p8), [#allocation3], %s1440_s7 }
  0x61   : > { %s1444_s10 = scalar_lea.vmem (!%p1308_p8), [#allocation2], %s757_s8  ;;  %p1574_p4 = scmp.ne.s32.totalorder (!%p1308_p8), %s1567_s21, 0 }
  0x66   : > { %1206 = dma.done.wait (%p1574_p4), %s210_s26, 4096  }
  0x67   : > { %1208 = vsyncadd (%p1574_p4), %s210_s26, 4294963200  ;;  %p1575_p5 = scmp.eq.s32.totalorder %s1289_s19, 0 }
  0x69   : > { %1210 = dma.done.wait (%p1575_p5), [#allocation6], 6144   ;;  %p1576_p8 = pmov %p1575_p5 }
  0x6a   : > { %v296_v0 = vld [vmem:[#allocation5 + $0x80] sm:$0xff]  ;;  %v297_v1 = vld [vmem:[#allocation5 + $0x88] sm:$0xff]  ;;  %v298_v5 = vld [vmem:[#allocation5 + $0x90] sm:$0xff]  ;;  %s760_s21 = sshll.u32 %s1440_s7, 7  ;;  %s769_s5 = sshll.u32 %s1289_s19, 11 }
  0x6b   : > { %1212 = vsyncadd (%p1576_p8), [#allocation6], 4294961152  ;;  %v280_v2 = vld [vmem:[#allocation5] sm:$0xff]  ;;  %v938_v3 = vpack.c.bf16 %v297_v1, %v296_v0  ;;  %v281_v4 = vld [vmem:[#allocation5 + $0x8] sm:$0xff]  ;;  %s1490_s30 = scalar_lea.vmem [#allocation8], %s760_s21  ;;  %s1511_s28 = scalar_lea.hbm %s1563_s4, %s769_s5 }
  0x6c   : > { %v299_v6 = vld [vmem:[#allocation5 + $0x98] sm:$0xff]  ;;  %v940_v7 = vpack.c.bf16 %v281_v4, %v280_v2  ;;  %v282_v9 = vld [vmem:[#allocation5 + $0x10] sm:$0xff]  ;;  %v300_v11 = vld [vmem:[#allocation5 + $0xa0] sm:$0xff]  ;;  %s655_s6 = sshll.u32 %s1490_s30, 4  ;;  %s642_s11 = scalar_lea.sflag [#allocation4], %s1440_s7  ;;  %s1513_s6 = int_to_ptr.vmem [resolvable:$true] %s655_s6 }
  0x6d   : > { %v942_v8 = vpack.c.bf16 %v299_v6, %v298_v5  ;;  %v283_v10 = vld [vmem:[#allocation5 + $0x18] sm:$0xff]  ;;  %939 = vmatprep.subr.bf16.mxu0 %v938_v3  ;;  %v301_v12 = vld [vmem:[#allocation5 + $0xa8] sm:$0xff]  ;;  %v284_v15 = vld [vmem:[#allocation5 + $0x20] sm:$0xff]  ;;  %s1161_s12 = scalar_lea.vmem %s1513_s6, 2048  ;;  %p1577_p0 = scmp.ne.s32.totalorder %s1572_s13, 0 }
  0x6e   : > { %941 = vmatpush3.bf16.msra.mxu0 %v940_v7  ;;  %v944_v13 = vpack.c.bf16 %v283_v10, %v282_v9  ;;  %v946_v14 = vpack.c.bf16 %v301_v12, %v300_v11  ;;  %v285_v16 = vld [vmem:[#allocation5 + $0x28] sm:$0xff]  ;;  %v302_v17 = vld [vmem:[#allocation5 + $0xb0] sm:$0xff]  ;;  %v303_v18 = vld [vmem:[#allocation5 + $0xb8] sm:$0xff]  ;;  %p1162_p11 = scmp.ne.s32.totalorder %s1513_s6, %s1161_s12  ;;  %s1240_s19 = smov [#allocation8]  }
  0x6f   : > { %943 = vmatprep.subr.bf16.mxu0 %v942_v8  ;;  %v948_v19 = vpack.c.bf16 %v285_v16, %v284_v15  ;;  %v950_v20 = vpack.c.bf16 %v303_v18, %v302_v17  ;;  %v286_v21 = vld [vmem:[#allocation5 + $0x30] sm:$0xff]  ;;  %v287_v22 = vld [vmem:[#allocation5 + $0x38] sm:$0xff]  ;;  %v304_v23 = vld [vmem:[#allocation5 + $0xc0] sm:$0xff]  ;;  %s1165_s29 = sshll.u32 %s1240_s19, 4  ;;  %s1166_s29 = int_to_ptr.vmem [resolvable:$false] %s1165_s29 }
  0x70   : > { %v305_v24 = vld [vmem:[#allocation5 + $0xc8] sm:$0xff]  ;;  %v952_v26 = vpack.c.bf16 %v287_v22, %v286_v21  ;;  %v288_v28 = vld [vmem:[#allocation5 + $0x40] sm:$0xff]  ;;  %v306_v30 = vld [vmem:[#allocation5 + $0xd0] sm:$0xff]  ;;  %p1163_p1 = pnand %p1162_p11, %p1577_p0  ;;  %s1167_s25 = scalar_lea.vmem %s1166_s29, 4096 }
  0x71   : > { %v249_v25 = vld [vmem:[%s1444_s10 + $0x8] sm:$0xff]  ;;  %v954_v27 = vpack.c.bf16 %v305_v24, %v304_v23  ;;  %v307_v31 = vld [vmem:[#allocation5 + $0xd8] sm:$0xff]  ;;  %v290_v34 = vld [vmem:[#allocation5 + $0x50] sm:$0xff]  ;;  %p1168_p7 = scmp.lt.s32.totalorder %s1513_s6, %s1166_s29  ;;  %p1169_p9 = scmp.lt.s32.totalorder %s1167_s25, %s1161_s12 }
  0x72   : > { %945 = vmatpush3.bf16.msra.mxu0 %v944_v13  ;;  %376 = vmatprep.mubr.f32.mxu0 %v249_v25  ;;  %v289_v29 = vld [vmem:[#allocation5 + $0x48] sm:$0xff]  ;;  %v958_v33 = vpack.c.bf16 %v307_v31, %v306_v30  ;;  %v291_v35 = vld [vmem:[#allocation5 + $0x58] sm:$0xff]  ;;  %v308_v36 = vld [vmem:[#allocation5 + $0xe0] sm:$0xff]  ;;  %p1164_p3 = pneg %p1163_p1 }
  0x73   : > { %947 = vmatprep.subr.bf16.mxu0 %v946_v14  ;;  %v956_v32 = vpack.c.bf16 %v289_v29, %v288_v28  ;;  %v309_v37 = vld [vmem:[#allocation5 + $0xe8] sm:$0xff]  ;;  %v960_v38 = vpack.c.bf16 %v291_v35, %v290_v34  ;;  %v292_v39 = vld [vmem:[#allocation5 + $0x60] sm:$0xff]  ;;  %v310_v42 = vld [vmem:[#allocation5 + $0xf0] sm:$0xff]  ;;  %p1170_p12 = por %p1169_p9, %p1168_p7 }
  0x74   : > { %v293_v40 = vld [vmem:[#allocation5 + $0x68] sm:$0xff]  ;;  %v962_v41 = vpack.c.bf16 %v309_v37, %v308_v36  ;;  %v457_v43 = vld [vmem:[#allocation7] sm:$0xff]  ;;  %v311_v45 = vld [vmem:[#allocation5 + $0xf8] sm:$0xff] }
  0x75   : > { %v458_v44 = vld [vmem:[#allocation7 + $0x8] sm:$0xff]  ;;  %v459_v47 = vld [vmem:[#allocation7 + $0x10] sm:$0xff]  ;;  %v460_v48 = vld [vmem:[#allocation7 + $0x18] sm:$0xff]  ;;  %v964_v52 = vpack.c.bf16 %v293_v40, %v292_v39  ;;  %v966_v53 = vpack.c.bf16 %v311_v45, %v310_v42  ;;  %p1171_p2 = pnand %p1170_p12, %p1164_p3 }
  0x76   : > { %949 = vmatpush3.bf16.msra.mxu0 %v948_v19  ;;  %v970_v46 = vpack.c.bf16 %v458_v44, %v457_v43  ;;  %v974_v49 = vpack.c.bf16 %v460_v48, %v459_v47  ;;  %v461_v50 = vld [vmem:[#allocation7 + $0x20] sm:$0xff]  ;;  %v462_v51 = vld [vmem:[#allocation7 + $0x28] sm:$0xff]  ;;  %v294_v54 = vld [vmem:[#allocation5 + $0x70] sm:$0xff] }
  0x77   : > { %951 = vmatprep.subr.bf16.mxu0 %v950_v20  ;;  %v295_v55 = vld [vmem:[#allocation5 + $0x78] sm:$0xff]  ;;  %v978_v56 = vpack.c.bf16 %v462_v51, %v461_v50  ;;  %v463_v57 = vld [vmem:[#allocation7 + $0x30] sm:$0xff]  ;;  %v465_v61 = vld [vmem:[#allocation7 + $0x40] sm:$0xff] }
  0x78   : > { %971 = vmatprep.subr.bf16.mxu1 %v970_v46  ;;  %v464_v58 = vld [vmem:[#allocation7 + $0x38] sm:$0xff]  ;;  %v968_v59 = vpack.c.bf16 %v295_v55, %v294_v54  ;;  %v466_v62 = vld [vmem:[#allocation7 + $0x48] sm:$0xff]  ;;  %v248_v63 = vld [vmem:[%s1444_s10] sm:$0xff] }
  0x79   : > { %973 = vmatpush3.bf16.msra.mxu1 %v970_v46  ;;  %v982_v60 = vpack.c.bf16 %v464_v58, %v463_v57  ;;  %v251_v0 = vld [vmem:[%s1444_s10 + $0x18] sm:$0xff]  ;;  %v986_v1 = vpack.c.bf16 %v466_v62, %v465_v61  ;;  %v467_v2 = vld [vmem:[#allocation7 + $0x50] sm:$0xff]  ;;  %v253_v5 = vld [vmem:[%s1444_s10 + $0x28] sm:$0xff] }
  0x7a   : > { %953 = vmatpush3.bf16.msra.mxu0 %v952_v26  ;;  %975 = vmatprep.subr.bf16.mxu1 %v974_v49  ;;  %v468_v3 = vld [vmem:[#allocation7 + $0x58] sm:$0xff]  ;;  %v250_v4 = vld [vmem:[%s1444_s10 + $0x10] sm:$0xff]  ;;  %v252_v7 = vld [vmem:[%s1444_s10 + $0x20] sm:$0xff] }
  0x7b   : > { %955 = vmatprep.subr.bf16.mxu0 %v954_v27  ;;  %v990_v6 = vpack.c.bf16 %v468_v3, %v467_v2  ;;  %v255_v8 = vld [vmem:[%s1444_s10 + $0x38] sm:$0xff]  ;;  %v254_v9 = vld [vmem:[%s1444_s10 + $0x30] sm:$0xff]  ;;  %v257_v10 = vld [vmem:[%s1444_s10 + $0x48] sm:$0xff] }
  0x7c   : > { %v256_v11 = vld [vmem:[%s1444_s10 + $0x40] sm:$0xff]  ;;  %v259_v12 = vld [vmem:[%s1444_s10 + $0x58] sm:$0xff]  ;;  %v258_v13 = vld [vmem:[%s1444_s10 + $0x50] sm:$0xff] }
  0x7d   : > { %977 = vmatpush3.bf16.msra.mxu1 %v974_v49  ;;  %v261_v14 = vld [vmem:[%s1444_s10 + $0x68] sm:$0xff]  ;;  %v260_v15 = vld [vmem:[%s1444_s10 + $0x60] sm:$0xff]  ;;  %v263_v16 = vld [vmem:[%s1444_s10 + $0x78] sm:$0xff] }
  0x7e   : > { %957 = vmatpush3.bf16.msra.mxu0 %v956_v32  ;;  %979 = vmatprep.subr.bf16.mxu1 %v978_v56  ;;  %v262_v17 = vld [vmem:[%s1444_s10 + $0x70] sm:$0xff]  ;;  %v265_v18 = vld [vmem:[%s1444_s10 + $0x88] sm:$0xff]  ;;  %v264_v19 = vld [vmem:[%s1444_s10 + $0x80] sm:$0xff] }
  0x7f   : > { %959 = vmatprep.subr.bf16.mxu0 %v958_v33  ;;  %v267_v20 = vld [vmem:[%s1444_s10 + $0x98] sm:$0xff]  ;;  %v266_v21 = vld [vmem:[%s1444_s10 + $0x90] sm:$0xff]  ;;  %v269_v22 = vld [vmem:[%s1444_s10 + $0xa8] sm:$0xff] }
  0x80   : > { %v268_v23 = vld [vmem:[%s1444_s10 + $0xa0] sm:$0xff]  ;;  %v271_v24 = vld [vmem:[%s1444_s10 + $0xb8] sm:$0xff]  ;;  %v270_v25 = vld [vmem:[%s1444_s10 + $0xb0] sm:$0xff] }
  0x81   : > { %981 = vmatpush3.bf16.msra.mxu1 %v978_v56  ;;  %v273_v26 = vld [vmem:[%s1444_s10 + $0xc8] sm:$0xff]  ;;  %v272_v27 = vld [vmem:[%s1444_s10 + $0xc0] sm:$0xff]  ;;  %v275_v28 = vld [vmem:[%s1444_s10 + $0xd8] sm:$0xff] }
  0x82   : > { %961 = vmatpush3.bf16.msra.mxu0 %v960_v38  ;;  %983 = vmatprep.subr.bf16.mxu1 %v982_v60  ;;  %v274_v29 = vld [vmem:[%s1444_s10 + $0xd0] sm:$0xff]  ;;  %v277_v30 = vld [vmem:[%s1444_s10 + $0xe8] sm:$0xff]  ;;  %v276_v31 = vld [vmem:[%s1444_s10 + $0xe0] sm:$0xff] }
  0x83   : > { %963 = vmatprep.subr.bf16.mxu0 %v962_v41  ;;  %v279_v32 = vld [vmem:[%s1444_s10 + $0xf8] sm:$0xff]  ;;  %v278_v33 = vld [vmem:[%s1444_s10 + $0xf0] sm:$0xff]  ;;  %v469_v34 = vld [vmem:[#allocation7 + $0x60] sm:$0xff] }
  0x84   : > { %v470_v35 = vld [vmem:[#allocation7 + $0x68] sm:$0xff]  ;;  %v471_v37 = vld [vmem:[#allocation7 + $0x70] sm:$0xff]  ;;  %v472_v38 = vld [vmem:[#allocation7 + $0x78] sm:$0xff] }
  0x85   : > { %985 = vmatpush3.bf16.msra.mxu1 %v982_v60  ;;  %v994_v36 = vpack.c.bf16 %v470_v35, %v469_v34  ;;  %v998_v39 = vpack.c.bf16 %v472_v38, %v471_v37 }
  0x86   : > { %965 = vmatpush3.bf16.msra.mxu0 %v964_v52  ;;  %987 = vmatprep.subr.bf16.mxu1 %v986_v1 }
  0x87   : > { %967 = vmatprep.subr.bf16.mxu0 %v966_v53 }
  0x89   : > { %989 = vmatpush3.bf16.msra.mxu1 %v986_v1 }
  0x8a   : > { %969 = vmatpush3.bf16.msra.mxu0 %v968_v59  ;;  %991 = vmatprep.subr.bf16.mxu1 %v990_v6 }
  0x8d   : > { %377 = vmatmul.mubr.f32.vlgmr.msra.gmra.mrb[0].mxu0 %v248_v63  ;;  %993 = vmatpush3.bf16.msra.mxu1 %v990_v6 }
  0x8e   : > { %381 = vmatprep.mubr.f32.mxu0 %v251_v0  ;;  %995 = vmatprep.subr.bf16.mxu1 %v994_v36 }
  0x91   : > { %382 = vmatmul.mubr.f32.gmra.mrb[2].mxu0 %v250_v4  ;;  %997 = vmatpush3.bf16.msra.mxu1 %v994_v36 }
  0x92   : > { %386 = vmatprep.mubr.f32.mxu0 %v253_v5  ;;  %999 = vmatprep.subr.bf16.mxu1 %v998_v39 }
  0x95   : > { %387 = vmatmul.mubr.f32.gmra.mrb[4].mxu0 %v252_v7  ;;  %1001 = vmatpush3.bf16.msra.mxu1 %v998_v39 }
  0x96   : > { %391 = vmatprep.mubr.f32.mxu0 %v255_v8 }
  0x99   : > { %392 = vmatmul.mubr.f32.gmra.mrb[6].mxu0 %v254_v9 }
  0x9a   : > { %396 = vmatprep.mubr.f32.mxu0 %v257_v10 }
  0x9d   : > { %397 = vmatmul.mubr.f32.gmra.mrb[8].mxu0 %v256_v11 }
  0x9e   : > { %401 = vmatprep.mubr.f32.mxu0 %v259_v12 }
  0xa1   : > { %402 = vmatmul.mubr.f32.gmra.mrb[10].mxu0 %v258_v13 }
  0xa2   : > { %406 = vmatprep.mubr.f32.mxu0 %v261_v14 }
  0xa5   : > { %407 = vmatmul.mubr.f32.gmra.mrb[12].mxu0 %v260_v15 }
  0xa6   : > { %411 = vmatprep.mubr.f32.mxu0 %v263_v16 }
  0xa9   : > { %412 = vmatmul.mubr.f32.gmra.mrb[14].mxu0 %v262_v17 }
  0xaa   : > { %416 = vmatprep.mubr.f32.mxu0 %v265_v18 }
  0xad   : > { %417 = vmatmul.mubr.f32.gmra.mrb[16].mxu0 %v264_v19 }
  0xae   : > { %421 = vmatprep.mubr.f32.mxu0 %v267_v20 }
  0xb1   : > { %422 = vmatmul.mubr.f32.gmra.mrb[18].mxu0 %v266_v21 }
  0xb2   : > { %426 = vmatprep.mubr.f32.mxu0 %v269_v22 }
  0xb5   : > { %427 = vmatmul.mubr.f32.gmra.mrb[20].mxu0 %v268_v23 }
  0xb6   : > { %431 = vmatprep.mubr.f32.mxu0 %v271_v24  ;;  %v761_v24 = vld [vmem:[%s1562_s3] ss:$0 sm:$0xff] }
  0xb9   : > { %432 = vmatmul.mubr.f32.gmra.mrb[22].mxu0 %v270_v25 }
  0xba   : > { %436 = vmatprep.mubr.f32.mxu0 %v273_v26 }
  0xbd   : > { %437 = vmatmul.mubr.f32.gmra.mrb[24].mxu0 %v272_v27 }
  0xbe   : > { %441 = vmatprep.mubr.f32.mxu0 %v275_v28 }
  0xc1   : > { %442 = vmatmul.mubr.f32.gmra.mrb[26].mxu0 %v274_v29 }
  0xc2   : > { %446 = vmatprep.mubr.f32.mxu0 %v277_v30 }
  0xc5   : > { %447 = vmatmul.mubr.f32.gmra.mrb[28].mxu0 %v276_v31 }
  0xc6   : > { %451 = vmatprep.mubr.f32.mxu0 %v279_v32 }
  0xc9   : > { %452 = vmatmul.mubr.f32.gmra.mrb[30].mxu0 %v278_v33 }
 0x160   : > { %v802_v40 = vpop.f32.mrb[0].mxu0 }
 0x161   : > { %v803_v41 = vpop.f32.mrb[1].mxu0 }
 0x162   : > { %v804_v42 = vadd.f32 %v803_v41, %v802_v40 }
 0x164   : > { %v805_v43 = vpop.f32.mrb[2].mxu0  ;;  %914 = vmatprep.mubr.f32.mxu1 %v804_v42 }
 0x165   : > { %v806_v44 = vpop.f32.mrb[3].mxu0 }
 0x166   : > { %v807_v45 = vadd.f32 %v806_v44, %v805_v43 }
 0x168   : > { %v808_v46 = vpop.f32.mrb[4].mxu0  ;;  %915 = vmatmul.mubr.f32.vlgmr.msra.gmra.mrb[0].mxu1 %v807_v45 }
 0x169   : > { %v809_v47 = vpop.f32.mrb[5].mxu0 }
 0x16a   : > { %v810_v48 = vadd.f32 %v809_v47, %v808_v46 }
 0x16c   : > { %v811_v49 = vpop.f32.mrb[6].mxu0  ;;  %917 = vmatprep.mubr.f32.mxu1 %v810_v48 }
 0x16d   : > { %v812_v50 = vpop.f32.mrb[7].mxu0 }
 0x16e   : > { %v813_v51 = vadd.f32 %v812_v50, %v811_v49 }
 0x170   : > { %v814_v52 = vpop.f32.mrb[8].mxu0  ;;  %918 = vmatmul.mubr.f32.gmra.mrb[2].mxu1 %v813_v51 }
 0x171   : > { %v815_v53 = vpop.f32.mrb[9].mxu0 }
 0x172   : > { %v816_v54 = vadd.f32 %v815_v53, %v814_v52 }
 0x174   : > { %v817_v55 = vpop.f32.mrb[10].mxu0  ;;  %920 = vmatprep.mubr.f32.mxu1 %v816_v54 }
 0x175   : > { %v818_v56 = vpop.f32.mrb[11].mxu0 }
 0x176   : > { %v819_v57 = vadd.f32 %v818_v56, %v817_v55 }
 0x178   : > { %v820_v58 = vpop.f32.mrb[12].mxu0  ;;  %921 = vmatmul.mubr.f32.gmra.mrb[4].mxu1 %v819_v57 }
 0x179   : > { %v821_v59 = vpop.f32.mrb[13].mxu0 }
 0x17a   : > { %v822_v60 = vadd.f32 %v821_v59, %v820_v58 }
 0x17c   : > { %v823_v61 = vpop.f32.mrb[14].mxu0  ;;  %923 = vmatprep.mubr.f32.mxu1 %v822_v60 }
 0x17d   : > { %v824_v62 = vpop.f32.mrb[15].mxu0 }
 0x17e   : > { %v825_v63 = vadd.f32 %v824_v62, %v823_v61 }
 0x180   : > { %v826_v0 = vpop.f32.mrb[16].mxu0  ;;  %924 = vmatmul.mubr.f32.gmra.mrb[6].mxu1 %v825_v63 }
 0x181   : > { %v827_v1 = vpop.f32.mrb[17].mxu0 }
 0x182   : > { %v828_v2 = vadd.f32 %v827_v1, %v826_v0 }
 0x184   : > { %v829_v3 = vpop.f32.mrb[18].mxu0  ;;  %926 = vmatprep.mubr.f32.mxu1 %v828_v2 }
 0x185   : > { %v830_v4 = vpop.f32.mrb[19].mxu0 }
 0x186   : > { %v831_v5 = vadd.f32 %v830_v4, %v829_v3 }
 0x188   : > { %v832_v6 = vpop.f32.mrb[20].mxu0  ;;  %927 = vmatmul.mubr.f32.gmra.mrb[8].mxu1 %v831_v5 }
 0x189   : > { %v833_v7 = vpop.f32.mrb[21].mxu0 }
 0x18a   : > { %v834_v8 = vadd.f32 %v833_v7, %v832_v6 }
 0x18c   : > { %v835_v9 = vpop.f32.mrb[22].mxu0  ;;  %929 = vmatprep.mubr.f32.mxu1 %v834_v8 }
 0x18d   : > { %v836_v10 = vpop.f32.mrb[23].mxu0 }
 0x18e   : > { %v837_v11 = vadd.f32 %v836_v10, %v835_v9 }
 0x190   : > { %v838_v12 = vpop.f32.mrb[24].mxu0  ;;  %930 = vmatmul.mubr.f32.gmra.mrb[10].mxu1 %v837_v11 }
 0x191   : > { %v839_v13 = vpop.f32.mrb[25].mxu0 }
 0x192   : > { %v840_v14 = vadd.f32 %v839_v13, %v838_v12 }
 0x194   : > { %v841_v15 = vpop.f32.mrb[26].mxu0  ;;  %932 = vmatprep.mubr.f32.mxu1 %v840_v14 }
 0x195   : > { %v842_v16 = vpop.f32.mrb[27].mxu0 }
 0x196   : > { %v843_v17 = vadd.f32 %v842_v16, %v841_v15 }
 0x198   : > { %v844_v18 = vpop.f32.mrb[28].mxu0  ;;  %933 = vmatmul.mubr.f32.gmra.mrb[12].mxu1 %v843_v17 }
 0x199   : > { %v845_v19 = vpop.f32.mrb[29].mxu0 }
 0x19a   : > { %v846_v20 = vadd.f32 %v845_v19, %v844_v18 }
 0x19c   : > { %v847_v21 = vpop.f32.mrb[30].mxu0  ;;  %935 = vmatprep.mubr.f32.mxu1 %v846_v20 }
 0x19d   : > { %v848_v22 = vpop.f32.mrb[31].mxu0 }
 0x19e   : > { %v849_v23 = vadd.f32 %v848_v22, %v847_v21 }
 0x1a0   : > { %936 = vmatmul.mubr.f32.gmra.mrb[14].mxu1 %v849_v23 }
 0x23b   : > { %v916_v25 = vpop.f32.mrb[0].mxu1 }
 0x23c   : > { %v552_v26 = vadd.f32 %v916_v25, %v761_v24  ;;  %v546_v27 = vpop.f32.mrb[1].mxu1 }
 0x23d   : > { %v547_v28 = vadd.f32 %v761_v24, %v546_v27 }
 0x23e   : > { %626 = vst [vmem:[%s1490_s30 + $0x8] sm:$0xff] %v552_v26 }
 0x23f   : > { %625 = vst [vmem:[%s1490_s30] sm:$0xff] %v547_v28 }
 0x243   : > { %v919_v29 = vpop.f32.mrb[2].mxu1 }
 0x244   : > { %v562_v30 = vadd.f32 %v919_v29, %v761_v24  ;;  %v556_v31 = vpop.f32.mrb[3].mxu1 }
 0x245   : > { %v557_v32 = vadd.f32 %v761_v24, %v556_v31 }
 0x246   : > { %628 = vst [vmem:[%s1490_s30 + $0x18] sm:$0xff] %v562_v30 }
 0x247   : > { %627 = vst [vmem:[%s1490_s30 + $0x10] sm:$0xff] %v557_v32 }
 0x24b   : > { %v922_v33 = vpop.f32.mrb[4].mxu1 }
 0x24c   : > { %v572_v34 = vadd.f32 %v922_v33, %v761_v24  ;;  %v566_v35 = vpop.f32.mrb[5].mxu1 }
 0x24d   : > { %v567_v36 = vadd.f32 %v761_v24, %v566_v35 }
 0x24e   : > { %630 = vst [vmem:[%s1490_s30 + $0x28] sm:$0xff] %v572_v34 }
 0x24f   : > { %629 = vst [vmem:[%s1490_s30 + $0x20] sm:$0xff] %v567_v36 }
 0x253   : > { %v925_v37 = vpop.f32.mrb[6].mxu1 }
 0x254   : > { %v582_v38 = vadd.f32 %v925_v37, %v761_v24  ;;  %v576_v39 = vpop.f32.mrb[7].mxu1 }
 0x255   : > { %v577_v40 = vadd.f32 %v761_v24, %v576_v39 }
 0x256   : > { %632 = vst [vmem:[%s1490_s30 + $0x38] sm:$0xff] %v582_v38 }
 0x257   : > { %631 = vst [vmem:[%s1490_s30 + $0x30] sm:$0xff] %v577_v40 }
 0x25b   : > { %v928_v41 = vpop.f32.mrb[8].mxu1 }
 0x25c   : > { %v592_v42 = vadd.f32 %v928_v41, %v761_v24  ;;  %v586_v43 = vpop.f32.mrb[9].mxu1 }
 0x25d   : > { %v587_v44 = vadd.f32 %v761_v24, %v586_v43 }
 0x25e   : > { %634 = vst [vmem:[%s1490_s30 + $0x48] sm:$0xff] %v592_v42 }
 0x25f   : > { %633 = vst [vmem:[%s1490_s30 + $0x40] sm:$0xff] %v587_v44 }
 0x263   : > { %v931_v45 = vpop.f32.mrb[10].mxu1 }
 0x264   : > { %v602_v46 = vadd.f32 %v931_v45, %v761_v24  ;;  %v596_v47 = vpop.f32.mrb[11].mxu1 }
 0x265   : > { %v597_v48 = vadd.f32 %v761_v24, %v596_v47 }
 0x266   : > { %636 = vst [vmem:[%s1490_s30 + $0x58] sm:$0xff] %v602_v46 }
 0x267   : > { %635 = vst [vmem:[%s1490_s30 + $0x50] sm:$0xff] %v597_v48 }
 0x26b   : > { %v934_v49 = vpop.f32.mrb[12].mxu1 }
 0x26c   : > { %v612_v50 = vadd.f32 %v934_v49, %v761_v24  ;;  %v606_v51 = vpop.f32.mrb[13].mxu1 }
 0x26d   : > { %v607_v52 = vadd.f32 %v761_v24, %v606_v51 }
 0x26e   : > { %638 = vst [vmem:[%s1490_s30 + $0x68] sm:$0xff] %v612_v50 }
 0x26f   : > { %637 = vst [vmem:[%s1490_s30 + $0x60] sm:$0xff] %v607_v52 }
 0x273   : > { %v937_v53 = vpop.f32.mrb[14].mxu1 }
 0x274   : > { %v622_v54 = vadd.f32 %v937_v53, %v761_v24  ;;  %v616_v55 = vpop.f32.mrb[15].mxu1 }
 0x275   : > { %v617_v56 = vadd.f32 %v761_v24, %v616_v55 }
 0x276   : > { %640 = vst [vmem:[%s1490_s30 + $0x78] sm:$0xff] %v622_v54 }
 0x277   : > { %639 = vst [vmem:[%s1490_s30 + $0x70] sm:$0xff] %v617_v56 }
 0x278   : > { %1174 = shalt.err (!%p1171_p2)
}
 0x279   : > { %s1175_s8 = scalar_lea.hbm %s1511_s28, 2048  ;;  %s1179_s21 = scalar_lea.hbm %s1563_s4, 4096 }
 0x27a   : > { %p1176_p13 = scmp.ne.s32.totalorder %s1511_s28, %s1175_s8  ;;  %p1180_p4 = scmp.lt.u32.totalorder %s1511_s28, %s1563_s4 }
 0x27b   : > { %p1181_p5 = scmp.lt.u32.totalorder %s1179_s21, %s1175_s8  ;;  %p1183_p11 = scmp.lt.u32.totalorder %s1175_s8, %s1511_s28 }
 0x27c   : > { %p1177_p6 = pnand %p1176_p13, %p1577_p0 }
 0x27d   : > { %p1182_p8 = por %p1181_p5, %p1180_p4 }
 0x27e   : > { %p1178_p10 = pneg %p1177_p6 }
 0x27f   : > { %p1184_p1 = por %p1183_p11, %p1182_p8 }
 0x281   : > { %p1185_p3 = pnand %p1184_p1, %p1178_p10 }
 0x283   : > { %1188 = shalt.err (!%p1185_p3)
}
 0x284   : > { %s1241_s30 = smov 128   ;;  %s1242_s5 = smov 8  }
 0x285   : > { %1012 = dma.vmem_to_hbm [thread:$0]  (%p1577_p0), %s1513_s6, 2048, %s1511_s28, %s642_s11, %s1241_s30, %s1241_s30, %s1242_s5  }
 0x286 PF: > { %s670_s24 = sand.u32 1, %s1219_s15   ;;  %p1578_p7 = scmp.ne.s32.totalorder %s1568_s22, 0 }
 0x287   : > { %p1579_p9 = scmp.ge.s32.totalorder %s1231_s18, 2  ;;  %s671_s20 = scalar_lea.sflag [#allocation4], %s670_s24 }
 0x289   : > { %p1026_p12 = pnand %p1579_p9, %p1578_p7 }
 0x28b   : > { %1214 = dma.done.wait (!%p1026_p12), %s671_s20, 2048  }
 0x28c   : > { %1216 = vsyncadd (!%p1026_p12), %s671_s20, 4294965248  ;;  %p18_p2 = scmp.ge.s32.totalorder %s1378_s9, 4   ;;  %s1580_s15 = smov %s1223_s16 }
 0x28d   : > { %s1581_s16 = smov %s1227_s17  ;;  %s1582_s17 = smov %s1394_s14 }
 0x28e   : > { %s1583_s18 = smov %s1378_s9  ;;  %20 = sbr.rel (!%p18_p2) target bundleno = 6 (0x6), region = 89 }
 0x295   :  { %676 = vsyncpa [#allocation3], 1 }
 0x296   :  { %678 = vsyncpa [#allocation3 + $0x1], 1 }
 0x297   :  { %679 = vsyncpa [#allocation6], 1 }
 0x298   :  { %680 = vsyncpa [#allocation4], 1 }
 0x299   :  { %682 = vsyncpa [#allocation4 + $0x1], 1 }

</bundles_post_ra>
